<compile_context>
chip_gen: v7x
topology: tpu7x:2x2x1
jax: 0.10.0
libtpu: 0.0.40
codegen_flags: <defaults>
</compile_context>

<pallas_src>
import math
from functools import partial

import jax
import jax.numpy as jnp
from jax.experimental import pallas as pl
from jax.experimental.pallas import tpu as pltpu

_INV_SQRT2 = 1.0 / math.sqrt(2.0)
_FULL_K_MAX = 2048      # single-shot (no k grid axis) kernel up to this K
_LANE = 128


def _gelu_exact(x):
    # torch.nn.functional.gelu default == exact erf GELU.
    return 0.5 * x * (1.0 + jax.lax.erf(x * _INV_SQRT2))


def _fullk_kernel(x_ref, w_ref, b_ref, s_ref, o_ref):
    # x: (tm, K)   w: (tn, K) native (out, in) layout   b, s: (1, tn)   o: (tm, tn)
    acc = jax.lax.dot_general(
        x_ref[...], w_ref[...],
        dimension_numbers=(((1,), (1,)), ((), ())),
        preferred_element_type=jnp.float32,
    )
    scaled = (acc + b_ref[...]) * s_ref[...]
    o_ref[...] = _gelu_exact(scaled).astype(o_ref.dtype)


def _tiledk_kernel(x_ref, w_ref, b_ref, s_ref, o_ref, acc_ref):
    # x: (tm, tk)  w: (tn, tk)  b, s: (1, tn)  o: (tm, tn)  acc: (tm, tn) f32 scratch
    k = pl.program_id(2)

    @pl.when(k == 0)
    def _():
        acc_ref[...] = jnp.zeros_like(acc_ref)

    acc = acc_ref[...] + jax.lax.dot_general(
        x_ref[...], w_ref[...],
        dimension_numbers=(((1,), (1,)), ((), ())),
        preferred_element_type=jnp.float32,
    )
    acc_ref[...] = acc

    @pl.when(k == pl.num_programs(2) - 1)
    def _():
        # Reuse the freshly computed `acc` (no acc_ref re-read).
        scaled = (acc + b_ref[...]) * s_ref[...]
        o_ref[...] = _gelu_exact(scaled).astype(o_ref.dtype)


def _round_up(v, m):
    return ((v + m - 1) // m) * m


def _vmem_limit_bytes():
    # Generation-aware VMEM budget: leave headroom for compiler scratch and
    # pipeline buffers (v7x has only 64 MiB physical VMEM per TensorCore).
    cap = 64 << 20
    try:
        cap = int(getattr(pltpu.get_tpu_info(), "vmem_capacity_bytes", cap))
    except Exception:
        pass
    return max(32 << 20, min(cap - (16 << 20), 100 << 20))


def _pick_k_tiling(K, tk):
    """Return (K_pad, tk_eff, full_k).  Only the reduction axis is ever padded."""
    if K <= max(tk, _FULL_K_MAX):
        # tk == full K is always a legal block dim, regardless of 128-alignment.
        return K, K, True
    K_pad = _round_up(K, _LANE)
    # Largest multiple of 128 <= tk that divides the 128-aligned K (no big pads).
    tk_eff = _LANE
    t = (tk // _LANE) * _LANE
    while t >= _LANE:
        if K_pad % t == 0:
            tk_eff = t
            break
        t -= _LANE
    if tk_eff < min(512, tk):
        # A tiny tk kills arithmetic intensity; pad K up to a multiple of tk instead.
        K_pad = _round_up(K, tk)
        tk_eff = tk
    return K_pad, tk_eff, False


@partial(jax.jit, static_argnames=("tm", "tn", "tk", "use_bf16"))
def _forward_2d(x, weight, bias, scaling_factor, *, tm, tn, tk, use_bf16):
    B, D_in = x.shape
    D_out = weight.shape[0]
    out_dtype = x.dtype

    if use_bf16:
        # bf16 MXU operands, f32 accumulation (preferred_element_type=f32).
        x = x.astype(jnp.bfloat16)
        weight = weight.astype(jnp.bfloat16)

    b2 = bias.astype(jnp.float32).reshape(1, D_out)
    s2 = scaling_factor.astype(jnp.float32).reshape(1, D_out)

    K_pad, tk_eff, full_k = _pick_k_tiling(D_in, tk)
    if K_pad != D_in:
        # K MUST be zero padded (garbage in the contraction dim corrupts output).
        x = jnp.pad(x, ((0, 0), (0, K_pad - D_in)))
        weight = jnp.pad(weight, ((0, 0), (0, K_pad - D_in)))

    # No M/N padding: blocks equal to the full dim are always legal; otherwise
    # multiples of (8, 128) with Pallas edge masking handle partial tiles.
    tm_eff = B if B <= tm else tm
    tn_eff = D_out if D_out <= tn else tn
    grid_m = pl.cdiv(B, tm_eff)
    grid_n = pl.cdiv(D_out, tn_eff)

    itemsize = jnp.dtype(x.dtype).itemsize
    cost = pl.CostEstimate(
        flops=2 * B * D_out * K_pad,
        transcendentals=B * D_out,
        bytes_accessed=(B * K_pad + D_out * K_pad) * itemsize
        + 2 * D_out * 4
        + B * D_out * jnp.dtype(out_dtype).itemsize,
    )
    vmem_limit = _vmem_limit_bytes()

    if full_k:
        out = pl.pallas_call(
            _fullk_kernel,
            out_shape=jax.ShapeDtypeStruct((B, D_out), out_dtype),
            grid_spec=pltpu.PrefetchScalarGridSpec(
                num_scalar_prefetch=0,
                grid=(grid_m, grid_n),
                in_specs=[
                    pl.BlockSpec((tm_eff, K_pad), lambda i, j: (i, 0)),   # x
                    pl.BlockSpec((tn_eff, K_pad), lambda i, j: (j, 0)),   # W (out,in)
                    pl.BlockSpec((1, tn_eff), lambda i, j: (0, j)),       # bias
                    pl.BlockSpec((1, tn_eff), lambda i, j: (0, j)),       # scale
                ],
                out_specs=pl.BlockSpec((tm_eff, tn_eff), lambda i, j: (i, j)),
            ),
            compiler_params=pltpu.CompilerParams(
                dimension_semantics=("parallel", "parallel"),
                vmem_limit_bytes=vmem_limit,
            ),
            cost_estimate=cost,
        )(x, weight, b2, s2)
    else:
        grid_k = K_pad // tk_eff
        out = pl.pallas_call(
            _tiledk_kernel,
            out_shape=jax.ShapeDtypeStruct((B, D_out), out_dtype),
            grid_spec=pltpu.PrefetchScalarGridSpec(
                num_scalar_prefetch=0,
                grid=(grid_m, grid_n, grid_k),
                in_specs=[
                    pl.BlockSpec((tm_eff, tk_eff), lambda i, j, k: (i, k)),  # x
                    pl.BlockSpec((tn_eff, tk_eff), lambda i, j, k: (j, k)),  # W
                    pl.BlockSpec((1, tn_eff), lambda i, j, k: (0, j)),       # bias
                    pl.BlockSpec((1, tn_eff), lambda i, j, k: (0, j)),       # scale
                ],
                out_specs=pl.BlockSpec((tm_eff, tn_eff), lambda i, j, k: (i, j)),
                scratch_shapes=[pltpu.VMEM((tm_eff, tn_eff), jnp.float32)],
            ),
            compiler_params=pltpu.CompilerParams(
                dimension_semantics=("parallel", "parallel", "arbitrary"),
                vmem_limit_bytes=vmem_limit,
            ),
            cost_estimate=cost,
        )(x, weight, b2, s2)
    return out


def homeostatic_neuron_forward(x, weight, bias, scaling_factor, *,
                               tm=512, tn=512, tk=1024, use_bf16=False):
    """HomeostaticNeuron.forward: GELU((x @ W^T + b) * scaling_factor).

    x: (..., D_in); weight: (D_out, D_in); bias, scaling_factor: (D_out,).
    """
    lead = x.shape[:-1]
    d_in = x.shape[-1]
    y = _forward_2d(x.reshape(-1, d_in), weight, bias, scaling_factor,
                    tm=tm, tn=tn, tk=tk, use_bf16=use_bf16)
    return y.reshape(*lead, weight.shape[0])


def _reference(x, weight, bias, scaling_factor):
    out = jnp.dot(x, weight.T, precision=jax.lax.Precision.HIGHEST) + bias
    scaled = out * scaling_factor
    return 0.5 * scaled * (1.0 + jax.lax.erf(scaled * _INV_SQRT2))


if __name__ == "__main__":
    key = jax.random.PRNGKey(0)
    k_x, k_w, k_b, k_s = jax.random.split(key, 4)

    # Primary small example (matches the module: a small Linear + buffers).
    B, D_in, D_out = 8, 32, 64
    x = jax.random.normal(k_x, (B, D_in), dtype=jnp.float32)
    bound = 1.0 / math.sqrt(D_in)
    weight = jax.random.uniform(k_w, (D_out, D_in), minval=-bound, maxval=bound,
                                dtype=jnp.float32)
    bias = jax.random.uniform(k_b, (D_out,), minval=-bound, maxval=bound,
                              dtype=jnp.float32)
    scaling_factor = jnp.ones((D_out,), dtype=jnp.float32)  # buffer init = ones

    y = jax.block_until_ready(
        homeostatic_neuron_forward(x, weight, bias, scaling_factor))
    y_ref = _reference(x, weight, bias, scaling_factor)
    assert y.shape == (B, D_out)
    assert jnp.allclose(y, y_ref, atol=1e-3, rtol=1e-3), "small-shape mismatch"

    # Full-K path with multiple N blocks (one partial edge block -> masked store).
    k1, k2, k3, k4 = jax.random.split(jax.random.PRNGKey(1), 4)
    B2, K2, N2 = 512, 1024, 768
    x2 = jax.random.normal(k1, (B2, K2), dtype=jnp.float32)
    w2 = jax.random.normal(k2, (N2, K2), dtype=jnp.float32) * 0.02
    b2 = jax.random.normal(k3, (N2,), dtype=jnp.float32) * 0.02
    s2 = jax.random.uniform(k4, (N2,), minval=0.5, maxval=2.0, dtype=jnp.float32)
    y2 = jax.block_until_ready(homeostatic_neuron_forward(x2, w2, b2, s2))
    assert jnp.allclose(y2, _reference(x2, w2, b2, s2), atol=5e-3, rtol=5e-3), \
        "full-K mismatch"

    # Large K -> accumulator (k-grid) path, divisor-based tk (no K padding).
    k5, k6, k7, k8 = jax.random.split(jax.random.PRNGKey(2), 4)
    B3, K3, N3 = 256, 2304, 640
    x3 = jax.random.normal(k5, (B3, K3), dtype=jnp.float32)
    w3 = jax.random.normal(k6, (N3, K3), dtype=jnp.float32) * 0.01
    b3 = jax.random.normal(k7, (N3,), dtype=jnp.float32) * 0.01
    s3 = jax.random.uniform(k8, (N3,), minval=0.5, maxval=2.0, dtype=jnp.float32)
    y3 = jax.block_until_ready(homeostatic_neuron_forward(x3, w3, b3, s3))
    assert jnp.allclose(y3, _reference(x3, w3, b3, s3), atol=5e-3, rtol=5e-3), \
        "tiled-K mismatch"

    # Optional bf16 MXU path (f32 accumulation) with loosened tolerance.
    y2b = jax.block_until_ready(
        homeostatic_neuron_forward(x2, w2, b2, s2, use_bf16=True))
    assert jnp.allclose(y2b, _reference(x2, w2, b2, s2), atol=5e-2, rtol=5e-2), \
        "bf16 mismatch"

    print("KERNEL_OK")
</pallas_src>

<mosaic_0001>
module attributes {stable_mosaic.version = 11 : i64} {
  func.func @_fullk_kernel(%arg0: i32, %arg1: i32, %arg2: memref<8x32xf32, #tpu.memory_space<vmem>>, %arg3: memref<64x32xf32, #tpu.memory_space<vmem>>, %arg4: memref<1x64xf32, #tpu.memory_space<vmem>>, %arg5: memref<1x64xf32, #tpu.memory_space<vmem>>, %arg6: memref<8x64xf32, #tpu.memory_space<vmem>>) attributes {dimension_semantics = [#tpu.dimension_semantics<parallel>, #tpu.dimension_semantics<parallel>], iteration_bounds = array<i64: 1, 1>, scalar_prefetch = 0 : i64, scratch_operands = 0 : i64, tpu.core_type = #tpu.core_type<tc>, window_params = [{transform_indices = @transform_0, window_bounds = array<i64: 8, 32>}, {transform_indices = @transform_1, window_bounds = array<i64: 64, 32>}, {transform_indices = @transform_2, window_bounds = array<i64: 1, 64>}, {transform_indices = @transform_3, window_bounds = array<i64: 1, 64>}, {transform_indices = @transform_4, window_bounds = array<i64: 8, 64>}]} {
    %c0 = arith.constant 0 : index
    %c0_0 = arith.constant 0 : index
    %0 = vector.load %arg2[%c0, %c0_0] : memref<8x32xf32, #tpu.memory_space<vmem>>, vector<8x32xf32>
    %c0_1 = arith.constant 0 : index
    %c0_2 = arith.constant 0 : index
    %1 = vector.load %arg3[%c0_1, %c0_2] : memref<64x32xf32, #tpu.memory_space<vmem>>, vector<64x32xf32>
    %cst = arith.constant dense<0.000000e+00> : vector<8x64xf32>
    %2 = tpu.matmul %0, %1, %cst {dimension_numbers = #tpu.dot_dimension_numbers<[1], [1], [0], [0], [0, 0, 1, 0], [], []>} : vector<8x32xf32>, vector<64x32xf32>, vector<8x64xf32> -> vector<8x64xf32>
    %c0_3 = arith.constant 0 : index
    %c0_4 = arith.constant 0 : index
    %3 = vector.load %arg4[%c0_3, %c0_4] : memref<1x64xf32, #tpu.memory_space<vmem>>, vector<1x64xf32>
    %4 = vector.broadcast %3 : vector<1x64xf32> to vector<8x64xf32>
    %5 = arith.addf %2, %4 : vector<8x64xf32>
    %c0_5 = arith.constant 0 : index
    %c0_6 = arith.constant 0 : index
    %6 = vector.load %arg5[%c0_5, %c0_6] : memref<1x64xf32, #tpu.memory_space<vmem>>, vector<1x64xf32>
    %7 = vector.broadcast %6 : vector<1x64xf32> to vector<8x64xf32>
    %8 = arith.mulf %5, %7 : vector<8x64xf32>
    %cst_7 = arith.constant 5.000000e-01 : f32
    %9 = vector.broadcast %cst_7 : f32 to vector<8x64xf32>
    %10 = arith.mulf %9, %8 : vector<8x64xf32>
    %cst_8 = arith.constant 0.707106769 : f32
    %11 = vector.broadcast %cst_8 : f32 to vector<8x64xf32>
    %12 = arith.mulf %8, %11 : vector<8x64xf32>
    %13 = math.erf %12 : vector<8x64xf32>
    %cst_9 = arith.constant 1.000000e+00 : f32
    %14 = vector.broadcast %cst_9 : f32 to vector<8x64xf32>
    %15 = arith.addf %14, %13 : vector<8x64xf32>
    %16 = arith.mulf %10, %15 : vector<8x64xf32>
    %c0_10 = arith.constant 0 : index
    %c0_11 = arith.constant 0 : index
    %17 = vector.load %arg6[%c0_10, %c0_11] : memref<8x64xf32, #tpu.memory_space<vmem>>, vector<8x64xf32>
    tpu.vector_store %arg6[%c0_10, %c0_11], %16 {strides = array<i32>} : memref<8x64xf32, #tpu.memory_space<vmem>>, vector<8x64xf32>,
    return
  }
  func.func @transform_0(%arg0: i32, %arg1: i32) -> (i32, i32) {
    %c0_i32 = arith.constant 0 : i32
    %c0_i32_0 = arith.constant 0 : i32
    return %arg0, %c0_i32 : i32, i32
  }
  func.func @transform_1(%arg0: i32, %arg1: i32) -> (i32, i32) {
    %c0_i32 = arith.constant 0 : i32
    %c0_i32_0 = arith.constant 0 : i32
    return %arg1, %c0_i32 : i32, i32
  }
  func.func @transform_2(%arg0: i32, %arg1: i32) -> (i32, i32) {
    %c0_i32 = arith.constant 0 : i32
    %c0_i32_0 = arith.constant 0 : i32
    return %c0_i32, %arg1 : i32, i32
  }
  func.func @transform_3(%arg0: i32, %arg1: i32) -> (i32, i32) {
    %c0_i32 = arith.constant 0 : i32
    %c0_i32_0 = arith.constant 0 : i32
    return %c0_i32, %arg1 : i32, i32
  }
  func.func @transform_4(%arg0: i32, %arg1: i32) -> (i32, i32) {
    %c0_i32 = arith.constant 0 : i32
    return %arg0, %arg1 : i32, i32
  }
}

</mosaic_0001>

<bundles_post_ra>
// kernel: _forward_2d.1
= control target key start
LH: loop header
LB: loop body
LE: loop exit
PB: predicated region body
PF: predicated region fallthrough
CT: control target
= control target key end

     0   :  { %vm34_vm0 = vcmask 261120   ;;  %v246_v2 = vmov 0.0|0.0   ;;  %vm247_vm2 = vmmov 0   ;;  %v248_v5 = vmov 0.0   ;;  %s335_s0 = inlined_call_operand.vmem [shape: f32[8,32], index: 0, kind: input, shape index: {}]   ;;  %s336_s1 = inlined_call_operand.vmem [shape: f32[64,32], index: 1, kind: input, shape index: {}]   ;;  %s337_s2 = inlined_call_operand.vmem [shape: f32[1,64], index: 2, kind: input, shape index: {}]   ;;  %s338_s3 = inlined_call_operand.vmem [shape: f32[1,64], index: 3, kind: input, shape index: {}]   ;;  %s339_s4 = inlined_call_operand.hbm [shape: f32[8,64], index: 4, kind: output, shape index: {}]  }
   0x1   :  { %v19_v0 = vld [vmem:[%s336_s1] sm:$0xff]  ;;  %v20_v1 = vld [vmem:[%s336_s1 + $0x8] sm:$0xff]  ;;  %200 = vmatprep.subr.bf16.mxu0 %v246_v2  ;;  %vm283_vm1 = vmpackc.low %vm34_vm0, %vm34_vm0  ;;  %197 = vmatprep.mubr.msk.f32.mxu0 %vm247_vm2, %v248_v5 }
   0x2   :  { %v201_v3 = vpack.c.bf16 %v20_v1, %v19_v0 }
   0x4   :  { %203 = vmatpush3.bf16.xpose.msk.msra.mxu0 %vm283_vm1, %v201_v3 }
   0x5   :  { %9 = vsyncpa [#allocation3], 0  ;;  %204 = vmatprep.subr.bf16.mxu0 %v246_v2  ;;  %v21_v6 = vld [vmem:[%s336_s1 + $0x10] sm:$0xff]  ;;  %v22_v7 = vld [vmem:[%s336_s1 + $0x18] sm:$0xff]  ;;  %vm145_vm3 = vcmask 523264  }
   0x6   :  { %v205_v8 = vpack.c.bf16 %v22_v7, %v21_v6  ;;  %v23_v9 = vld [vmem:[%s336_s1 + $0x20] sm:$0xff]  ;;  %v24_v10 = vld [vmem:[%s336_s1 + $0x28] sm:$0xff]  ;;  %v25_v12 = vld [vmem:[%s336_s1 + $0x30] sm:$0xff] }
   0x7   :  { %v209_v11 = vpack.c.bf16 %v24_v10, %v23_v9  ;;  %v26_v13 = vld [vmem:[%s336_s1 + $0x38] sm:$0xff]  ;;  %v18_v15 = vld [vmem:[%s335_s0] sm:$0xff]  ;;  %s249_s1 = smov [#allocation2]  }
   0x8   :  { %v213_v14 = vpack.c.bf16 %v26_v13, %v25_v12  ;;  %v161_v16 = vld [vmem:[%s337_s2] ss:$0 sm:$0xff]  ;;  %s153_s11 = sshll.u32 %s249_s1, 4  ;;  %s154_s11 = int_to_ptr.vmem [resolvable:$true] %s153_s11 }
   0x9   :  { %v171_v18 = vld [vmem:[%s338_s3] ss:$0 sm:$0xff]  ;;  %s222_s0 = scalar_lea.vmem %s154_s11, 128  ;;  %p227_p1 = scmp.lt.s32.totalorder %s154_s11, %s154_s11 }
   0xa   :  { %p223_p0 = scmp.ne.s32.totalorder %s154_s11, %s222_s0  ;;  %p228_p2 = scmp.lt.s32.totalorder %s222_s0, %s222_s0 }
   0xc   :  { %207 = vmatpush3.bf16.xpose.msk.msra.mxu0 %vm283_vm1, %v205_v8  ;;  %p229_p3 = por %p228_p2, %p227_p1 }
   0xd   :  { %208 = vmatprep.subr.bf16.mxu0 %v246_v2 }
   0xe   :  { %p230_p4 = pnand %p229_p3, %p223_p0 }
  0x14   :  { %211 = vmatpush3.bf16.xpose.msk.msra.mxu0 %vm283_vm1, %v209_v11 }
  0x15   :  { %212 = vmatprep.subr.bf16.mxu0 %v246_v2 }
  0x1c   :  { %215 = vmatpush3.bf16.xpose.msk.msra.mxu0 %vm283_vm1, %v213_v14 }
  0x23   :  { %198 = vmatmul.mubr.msk.f32.vlgmr.msra.gmra.mrb[0].mxu0 %vm34_vm0, %v18_v15 }
  0xf6   :  { %v128_v17 = vpop.f32.mrb[0].mxu0 }
  0xf7   :  { %v129_v19 = vadd.f32 %v161_v16, %v128_v17  ;;  %v199_v20 = vpop.f32.mrb[1].mxu0 }
  0xf9   :  { %v139_v21 = vmul.f32 %v171_v18, %v129_v19 }
  0xfb   :  { %v141_v22 = vmul.f32 0.70710677, %v139_v21  ;;  %v140_v24 = vmul.f32 0.5, %v139_v21 }
  0xfd   :  { %220 = verf.f32 %v141_v22 }
 0x107   :  { %v221_v23 = vpop.eup %220 }
 0x108   :  { %v143_v25 = vadd.f32 1.0, %v221_v23 }
 0x10a   :  { %v144_v26 = vmul.f32 %v143_v25, %v140_v24 }
 0x10c   :  { %146 = vst.msk [vmem:[#allocation2] sm:$0xff] %vm145_vm3, %v144_v26 }
 0x10d   :  { %233 = shalt.err (!%p230_p4)
}
 0x10e   :  { %s234_s12 = scalar_lea.hbm %s339_s4, 128 }
 0x10f   :  { %p235_p5 = scmp.ne.s32.totalorder %s339_s4, %s234_s12  ;;  %p238_p6 = scmp.lt.u32.totalorder %s234_s12, %s339_s4 }
 0x111   :  { %p240_p7 = pnand %p238_p6, %p235_p5 }
 0x113   :  { %243 = shalt.err (!%p240_p7)
}
 0x114   :  { %156 = dma.vmem_to_hbm [thread:$0]  %s154_s11, 128, %s339_s4, [#allocation3]  }
 0x115   :  { %244 = dma.done.wait [#allocation3], 128  }
 0x116   :  { %245 = vsyncadd [#allocation3], 4294967168 }
 0x117   :  { %160 = vsyncpa [#allocation3], 1 }

</bundles_post_ra>
